<compile_context>
chip_gen: v5e
topology: v5e:2x2
jax: 0.10.0
libtpu: 0.0.40
codegen_flags: <defaults>
</compile_context>

<pallas_src>
import jax
import jax.numpy as jnp
from jax import lax
from jax.experimental import pallas as pl
from jax.experimental.pallas import tpu as pltpu

EPS = 1e-5

# x tiles: TB (sublane axis, multiple of 8) x TD (lane axis, multiple of 128).
# 512 x 1024 f32 = 2 MiB per tile -> 4 MiB double-buffered: fits every
# generation's default scoped VMEM (16 MiB v5e / 32 MiB v6e, v7x).
_TILE_B = 512
_TILE_D = 1024
# Below this x size the tiled path is pure fixed overhead; use the fused
# single-block kernel instead.
_TILED_THRESHOLD_BYTES = 2 * 1024 * 1024


def _round_up(n, m):
    return ((n + m - 1) // m) * m


# --------------------------------------------------------------------------
# Tiled path: kernel 1 — matvec y = x @ w^T, accumulated over D tiles.
# --------------------------------------------------------------------------
def _matvec_kernel(x_ref, w_ref, y_ref):
    k = pl.program_id(1)

    @pl.when(k == 0)
    def _():
        # Output block index is constant along k -> it stays VMEM-resident and
        # acts as the f32 accumulator (P3 init/finalize pattern).
        y_ref[...] = jnp.zeros_like(y_ref)

    x = x_ref[...]                                   # (TB, TD)
    w = w_ref[...]                                   # (1, TD)
    # VPU broadcast-multiply + XLU lane reduction; accumulate in f32.
    y_ref[...] += jnp.sum(x * w, axis=-1, keepdims=True)   # (TB, 1)


# --------------------------------------------------------------------------
# Tiled path: kernel 2 — BatchNorm1d(1) training-mode batch stats on y (1, B).
# Two-pass (centered) variance: y is tiny and fully resident, so this costs
# nothing extra and avoids E[y^2] - mean^2 cancellation.
# --------------------------------------------------------------------------
def _bn_kernel(y_ref, o_ref):
    y = y_ref[...]                                   # (1, B), batch on lanes
    inv_b = 1.0 / y.shape[1]
    mean = jnp.sum(y, axis=1, keepdims=True) * inv_b          # (1, 1)
    centered = y - mean
    var = jnp.sum(centered * centered, axis=1, keepdims=True) * inv_b
    o_ref[...] = centered * lax.rsqrt(var + EPS)              # (1, B)


# --------------------------------------------------------------------------
# Small path: fused single-block Linear + BatchNorm (no grid, no overhead).
# --------------------------------------------------------------------------
def _fused_small_kernel(x_ref, w_ref, o_ref):
    x = x_ref[...]                                   # (B, D)
    w = w_ref[...]                                   # (1, D)
    y = jnp.sum(x * w, axis=-1, keepdims=True)       # (B, 1)  VPU + lane reduce
    inv_b = 1.0 / y.shape[0]
    mean = jnp.sum(y, axis=0, keepdims=True) * inv_b
    centered = y - mean
    var = jnp.sum(centered * centered, axis=0, keepdims=True) * inv_b
    o_ref[...] = centered * lax.rsqrt(var + EPS)     # (B, 1)


def _forward_small(x, w):
    B, D = x.shape
    full = lambda shape: pl.BlockSpec(shape, lambda: (0,) * len(shape))
    return pl.pallas_call(
        _fused_small_kernel,
        out_shape=jax.ShapeDtypeStruct((B, 1), jnp.float32),
        in_specs=[full((B, D)), full((1, D))],
        out_specs=full((B, 1)),
    )(x, w)


def _forward_tiled(x, w):
    B, D = x.shape
    tb = min(_TILE_B, _round_up(B, 8))
    td = min(_TILE_D, _round_up(D, 128))
    bp, dp = _round_up(B, tb), _round_up(D, td)
    if (bp, dp) != (B, D):
        # TODO(synk): ragged edges currently pad x with zeros (one extra HBM
        # pass); an in-kernel iota mask on the last tile would avoid it.
        x = jnp.pad(x, ((0, bp - B), (0, dp - D)))
        w = jnp.pad(w, ((0, 0), (0, dp - D)))

    y_full = pl.pallas_call(
        _matvec_kernel,
        out_shape=jax.ShapeDtypeStruct((bp, 1), jnp.float32),
        grid=(bp // tb, dp // td),                       # D reduction is last
        in_specs=[
            pl.BlockSpec((tb, td), lambda i, k: (i, k)),  # streamed x tile
            pl.BlockSpec((1, td), lambda i, k: (0, k)),   # weight slice
        ],
        out_specs=pl.BlockSpec((tb, 1), lambda i, k: (i, 0)),  # resident acc
        compiler_params=pltpu.CompilerParams(
            dimension_semantics=("parallel", "arbitrary")),    # B tiles shard
    )(x, w)

    # BN epilogue on the tiny (4*B bytes) y vector, batch on the lane axis.
    y = y_full[:B].reshape(1, B)
    full = lambda shape: pl.BlockSpec(shape, lambda: (0,) * len(shape))
    out_1b = pl.pallas_call(
        _bn_kernel,
        out_shape=jax.ShapeDtypeStruct((1, B), jnp.float32),
        in_specs=[full((1, B))],
        out_specs=full((1, B)),
    )(y)
    return out_1b.reshape(B, 1)


def linear_model_forward(x, w, b=None):
    """LinearModel forward: Linear(D, 1) -> BatchNorm1d(1) (training mode).

    x: (B, D) f32 (bf16 also accepted for the streamed input; accumulation is
       f32 because w stays f32).
    w: (1, D) = nn.Linear(D, 1).weight (PyTorch layout).
    b: accepted for API fidelity but unused — with training-mode BatchNorm1d
       (gamma=1, beta=0) the Linear bias cancels exactly.  If eval mode /
       learned affine BN params are ever needed this elision must be removed.
    """
    del b
    B, D = x.shape
    if B < 2:
        # Matches PyTorch: BatchNorm1d raises for batch_size == 1 in training.
        raise ValueError("training-mode BatchNorm1d requires batch size > 1")

    nbytes = x.size * jnp.dtype(x.dtype).itemsize
    if nbytes <= _TILED_THRESHOLD_BYTES:
        return _forward_small(x, w)
    return _forward_tiled(x, w)


def init_params(key, in_dim, out_dim=1):
    # PyTorch nn.Linear init: U(-1/sqrt(fan_in), 1/sqrt(fan_in)).
    kw, kb = jax.random.split(key)
    bound = 1.0 / jnp.sqrt(in_dim)
    w = jax.random.uniform(kw, (out_dim, in_dim), jnp.float32, -bound, bound)
    b = jax.random.uniform(kb, (1, out_dim), jnp.float32, -bound, bound)
    return w, b


def _reference(x, w, b):
    """Pure-JAX reference with the FULL PyTorch math (bias included)."""
    y = (x * w[0]).sum(axis=-1, keepdims=True) + b            # (B, 1)
    m = jnp.mean(y, axis=0, keepdims=True)
    v = jnp.mean((y - m) ** 2, axis=0, keepdims=True)         # biased batch var
    return (y - m) * lax.rsqrt(v + EPS)


if __name__ == "__main__":
    key = jax.random.PRNGKey(0)
    kx, kp, kx2, kp2 = jax.random.split(key, 4)

    # 1) Small shape (module-sized) -> fused single-block path.
    B, D = 8, 32
    x = jax.random.normal(kx, (B, D), jnp.float32)
    w, b = init_params(kp, D)
    out = linear_model_forward(x, w, b)
    jax.block_until_ready(out)
    assert out.shape == (B, 1), out.shape
    assert jnp.allclose(out, _reference(x, w, b), atol=1e-4, rtol=1e-4)

    # 2) Larger shape -> tiled/pipelined path (grid (2, 2), B axis "parallel").
    B2, D2 = 1024, 2048
    x2 = jax.random.normal(kx2, (B2, D2), jnp.float32)
    w2, b2 = init_params(kp2, D2)
    out2 = linear_model_forward(x2, w2, b2)
    jax.block_until_ready(out2)
    assert out2.shape == (B2, 1), out2.shape
    assert jnp.allclose(out2, _reference(x2, w2, b2), atol=1e-3, rtol=1e-3)

    print("KERNEL_OK")
</pallas_src>

<mosaic_0001>
module attributes {stable_mosaic.version = 11 : i64} {
  func.func @_fused_small_kernel(%arg0: memref<8x32xf32, #tpu.memory_space<vmem>>, %arg1: memref<1x32xf32, #tpu.memory_space<vmem>>, %arg2: memref<8x1xf32, #tpu.memory_space<vmem>>) attributes {dimension_semantics = [], scalar_prefetch = 0 : i64, scratch_operands = 0 : i64, tpu.core_type = #tpu.core_type<tc>} {
    %c0 = arith.constant 0 : index
    %c0_0 = arith.constant 0 : index
    %0 = vector.load %arg0[%c0, %c0_0] : memref<8x32xf32, #tpu.memory_space<vmem>>, vector<8x32xf32>
    %c0_1 = arith.constant 0 : index
    %c0_2 = arith.constant 0 : index
    %1 = vector.load %arg1[%c0_1, %c0_2] : memref<1x32xf32, #tpu.memory_space<vmem>>, vector<1x32xf32>
    %2 = vector.broadcast %1 : vector<1x32xf32> to vector<8x32xf32>
    %3 = arith.mulf %0, %2 : vector<8x32xf32>
    %cst = arith.constant dense<0.000000e+00> : vector<8xf32>
    %4 = vector.multi_reduction <add>, %3, %cst [1] : vector<8x32xf32> to vector<8xf32>
    %5 = vector.shape_cast %4 : vector<8xf32> to vector<8x1xf32>
    %cst_3 = arith.constant dense<0.000000e+00> : vector<1xf32>
    %6 = vector.multi_reduction <add>, %5, %cst_3 [0] : vector<8x1xf32> to vector<1xf32>
    %7 = vector.shape_cast %6 : vector<1xf32> to vector<1x1xf32>
    %cst_4 = arith.constant 1.250000e-01 : f32
    %8 = vector.broadcast %cst_4 : f32 to vector<1x1xf32>
    %9 = arith.mulf %7, %8 : vector<1x1xf32>
    %10 = vector.broadcast %9 : vector<1x1xf32> to vector<8x1xf32>
    %11 = arith.subf %5, %10 : vector<8x1xf32>
    %12 = arith.mulf %11, %11 : vector<8x1xf32>
    %cst_5 = arith.constant dense<0.000000e+00> : vector<1xf32>
    %13 = vector.multi_reduction <add>, %12, %cst_5 [0] : vector<8x1xf32> to vector<1xf32>
    %14 = vector.shape_cast %13 : vector<1xf32> to vector<1x1xf32>
    %cst_6 = arith.constant 1.250000e-01 : f32
    %15 = vector.broadcast %cst_6 : f32 to vector<1x1xf32>
    %16 = arith.mulf %14, %15 : vector<1x1xf32>
    %cst_7 = arith.constant 9.99999974E-6 : f32
    %17 = vector.broadcast %cst_7 : f32 to vector<1x1xf32>
    %18 = arith.addf %16, %17 : vector<1x1xf32>
    %19 = math.rsqrt %18 : vector<1x1xf32>
    %20 = vector.broadcast %19 : vector<1x1xf32> to vector<8x1xf32>
    %21 = arith.mulf %11, %20 : vector<8x1xf32>
    %c0_8 = arith.constant 0 : index
    %c0_9 = arith.constant 0 : index
    %22 = vector.load %arg2[%c0_8, %c0_9] : memref<8x1xf32, #tpu.memory_space<vmem>>, vector<8x1xf32>
    tpu.vector_store %arg2[%c0_8, %c0_9], %21 {strides = array<i32>} : memref<8x1xf32, #tpu.memory_space<vmem>>, vector<8x1xf32>,
    return
  }
}

</mosaic_0001>

<bundles_post_ra>
// kernel: tpu_custom_call.1
= control target key start
LH: loop header
LB: loop body
LE: loop exit
PB: predicated region body
PF: predicated region fallthrough
CT: control target
= control target key end

     0   :  { %7 = vsyncpa [#allocation3], 0  ;;  %s168_s0 = inlined_call_operand.hbm [shape: f32[8,32], index: 0, kind: input, shape index: {}]   ;;  %s169_s1 = inlined_call_operand.hbm [shape: f32[1,32], index: 1, kind: input, shape index: {}]   ;;  %s170_s2 = inlined_call_operand.vmem [shape: f32[8,1], index: 2, kind: output, shape index: {}]  }
   0x1   :  { %s14_s11 = sshll.u32 %s168_s0, 4  ;;  %s15_s11 = int_to_ptr.hbm [resolvable:$true] %s14_s11 }
   0x2   :  { %8 = vsyncpa [#allocation5], 0  ;;  %s142_s12 = smov [#allocation2]   ;;  %s25_s16 = sshll.u32 %s169_s1, 4  ;;  %s26_s16 = int_to_ptr.hbm [resolvable:$true] %s25_s16 }
   0x3   :  { %s16_s13 = sshll.u32 %s142_s12, 4  ;;  %s143_s17 = smov [#allocation4]   ;;  %s17_s13 = int_to_ptr.vmem [resolvable:$true] %s16_s13 }
   0x4   :  { %19 = dma.hbm_to_vmem [thread:$0]  %s15_s11, 128, %s17_s13, [#allocation3]  }
   0x5   :  { %s27_s18 = sshll.u32 %s143_s17, 4  ;;  %s28_s18 = int_to_ptr.vmem [resolvable:$true] %s27_s18 }
   0x6   :  { %30 = dma.hbm_to_vmem [thread:$0]  %s26_s16, 16, %s28_s18, [#allocation5]  }
   0x7   :  { %138 = dma.done.wait [#allocation3], 128  }
   0x8   :  { %139 = vsyncadd [#allocation3], 4294967168 }
   0x9   :  { %140 = dma.done.wait [#allocation5], 16  }
   0xa   :  { %141 = vsyncadd [#allocation5], 4294967280  ;;  %v39_v0 = vld [vmem:[#allocation2] sm:$0xff]  ;;  %v87_v1 = vld [vmem:[#allocation4] ss:$0 sm:$0xff]  ;;  %vm45_vm0 = vcmask 261120  }
   0xb   :  { %v44_v2 = vmul.f32 %v87_v1, %v39_v0  ;;  %vm77_vm4 = vcmask 7168  }
   0xd   :  { %v46_v3 = vsel %vm45_vm0, %v44_v2, 0.0 }
   0xe   :  { %47 = vadd.xlane.f32.xlu0 %v46_v3 }
  0x81   :  { %v48_v4 = vpop.xlane.xlu0 %47 }
  0x82   :  { %v49_v5 = vrot.slane %v48_v4, 4 }
  0x84   :  { %v50_v6 = vadd.f32 %v49_v5, %v48_v4 }
  0x86   :  { %v51_v7 = vrot.slane %v50_v6, 2 }
  0x88   :  { %v52_v8 = vadd.f32 %v51_v7, %v50_v6 }
  0x8a   :  { %v53_v9 = vrot.slane %v52_v8, 1 }
  0x8c   :  { %v54_v10 = vadd.f32 %v53_v9, %v52_v8 }
  0x8e   :  { %v55_v11 = vmul.f32 0.125, %v54_v10 }
  0x90   :  { %v56_v12 = vsub.f32 %v48_v4, %v55_v11 }
  0x92   :  { %v57_v13 = vmul.f32 %v56_v12, %v56_v12 }
  0x94   :  { %v58_v14 = vrot.slane %v57_v13, 4 }
  0x96   :  { %v59_v15 = vadd.f32 %v58_v14, %v57_v13 }
  0x98   :  { %v60_v16 = vrot.slane %v59_v15, 2 }
  0x9a   :  { %v61_v17 = vadd.f32 %v60_v16, %v59_v15 }
  0x9c   :  { %v62_v18 = vrot.slane %v61_v17, 1 }
  0x9e   :  { %v63_v19 = vadd.f32 %v62_v18, %v61_v17 }
  0xa0   :  { %v64_v20 = vmul.f32 0.125, %v63_v19 }
  0xa2   :  { %v65_v21 = vadd.f32 1e-05, %v64_v20 }
  0xa4   :  { %88 = vrsqrt.f32 %v65_v21  ;;  %vm72_vm2 = vweird.f32 %v65_v21 }
  0xaa   :  { %v89_v22 = vpop.eup %88 }
  0xab   :  { %v67_v23 = vmul.f32 %v89_v22, %v65_v21  ;;  %vm73_vm1 = vweird.f32 %v89_v22 }
  0xac   :  { %vm74_vm3 = vmor %vm72_vm2, %vm73_vm1 }
  0xad   :  { %v68_v24 = vmul.f32 %v89_v22, %v67_v23 }
  0xaf   :  { %v69_v25 = vmul.f32 0.5, %v68_v24 }
  0xb1   :  { %v70_v26 = vsub.f32 1.5, %v69_v25 }
  0xb3   :  { %v71_v27 = vmul.f32 %v89_v22, %v70_v26 }
  0xb5   :  { %v75_v28 = vsel %vm74_vm3, %v89_v22, %v71_v27 }
  0xb6   :  { %v76_v29 = vmul.f32 %v75_v28, %v56_v12 }
  0xb8   :  { %78 = vst.msk [vmem:[%s170_s2] sm:$0xff] %vm77_vm4, %v76_v29 }
  0xb9   :  { %83 = vsyncpa [#allocation3], 1 }
  0xba   :  { %84 = vsyncpa [#allocation5], 1 }

</bundles_post_ra>
